<compile_context>
chip_gen: v6e
topology: v6e:2x2x1
jax: 0.10.0
libtpu: 0.0.40
codegen_flags: <defaults>
</compile_context>

<pallas_src>
import numpy as np
import jax
import jax.numpy as jnp
from jax.experimental import pallas as pl
from jax.experimental.pallas import tpu as pltpu


def _mul_kernel(x_ref, s_ref, o_ref):
    # x_ref: (rb, cw); s_ref: (rb, 1) (channel scale, lane-broadcast) or
    # (rb, cw) (elementwise); o_ref: (rb, cw).  Pure VPU broadcast-multiply.
    o_ref[...] = (x_ref[...] * s_ref[...]).astype(o_ref.dtype)


def _sublane_multiple(*dtypes):
    """Packed sub-32-bit dtypes need 16 (2-byte) / 32 (1-byte) row multiples."""
    mult = 8
    for d in dtypes:
        isz = max(1, jnp.dtype(d).itemsize)
        mult = max(mult, 8 * max(1, 4 // isz))
    return mult


def _round_up(v, m):
    return ((v + m - 1) // m) * m


def _round_down(v, m):
    return (v // m) * m


def _choose_tiles(M, L, row_align, itemsize, target_bytes):
    """Pick (rb, cw): lane-dense column tile (multiple of 128 or full L) and a
    dtype-aligned row tile sized to ~target_bytes per slab, guaranteeing >=2
    total grid steps whenever the shape allows (dual-TC split on v7x)."""
    # Column (lane) tile.
    if L <= 128 or L * row_align * itemsize <= target_bytes:
        cw = L  # full last dim is always a legal block dim
    else:
        cw = max(128, _round_down(target_bytes // (row_align * itemsize), 128))
        cw = min(cw, max(128, _round_down(L, 128)))
    # Row (sublane) tile.
    if M <= row_align:
        rb = M  # full dim block is always legal
    else:
        rb = max(row_align,
                 _round_down(target_bytes // max(1, cw * itemsize), row_align))
        rb = min(rb, _round_down(M, row_align))
    # Guarantee >= 2 grid steps so "parallel" semantics can actually shard
    # across both TensorCores on v7x.
    if pl.cdiv(M, rb) * pl.cdiv(L, cw) < 2:
        if M > row_align:
            rb = _round_up(pl.cdiv(M, 2), row_align)
            rb = min(rb, _round_down(M, row_align))
        elif L > 128:
            cw = max(128, _round_down(pl.cdiv(L, 2), 128))
    return rb, cw


def scale_channels(x, other, *, target_block_bytes=4 << 20,
                   min_pallas_bytes=256 << 10, force_pallas=False):
    """JAX/Pallas equivalent of ScaleChannels().forward(x, other) = other * x.

    Kernel path handles `other` broadcastable to (N, C, 1, 1) (per-channel
    scale, the canonical use) or exactly x-shaped (plain elementwise mul);
    anything else / tiny tensors / very lane-sparse spatial dims fall back to
    the fused XLA multiply (identical math).
    """
    # TODO(synk): quant=True (FloatFunctional.mul on quantized tensors) has no
    # JAX equivalent; this implements the float forward, whose math is identical.
    x = jnp.asarray(x)
    other = jnp.asarray(other)
    out_dtype = jnp.result_type(x.dtype, other.dtype)

    def _xla():
        return (other * x).astype(out_dtype)

    if x.ndim != 4:
        return _xla()

    N, C, H, W = x.shape
    M, L = N * C, H * W
    if M == 0 or L == 0:
        return _xla()

    out_isz = jnp.dtype(out_dtype).itemsize
    total_bytes = x.size * x.dtype.itemsize + M * L * out_isz
    if total_bytes < min_pallas_bytes and not force_pallas:
        # pallas_call launch/pipeline setup dominates for tiny tensors.
        return _xla()

    # Classify `other`: per-channel scale vs full-shape elementwise.
    try:
        channel_scale = (
            np.broadcast_shapes(tuple(other.shape), (N, C, 1, 1)) == (N, C, 1, 1))
    except ValueError:
        channel_scale = False

    if channel_scale:
        # Only M elements; this tiny broadcast/reshape is negligible.
        s2 = jnp.broadcast_to(other, (N, C, 1, 1)).astype(out_dtype).reshape(M, 1)
    elif tuple(other.shape) == (N, C, H, W):
        # Full-shape elementwise multiply: pass directly (no extra HBM pass).
        s2 = other.reshape(M, L)
    else:
        # Partial spatial broadcasts ((1,1,H,W), (N,1,H,W), ...): let XLA fuse
        # instead of materializing an extra M*L slab for the kernel.
        return _xla()

    # Lane-density check: shapes like 7x7 (=49 lanes) waste >50% of every
    # vector store; XLA handles those layouts at least as well.
    if L % 128 != 0 and (L / _round_up(L, 128)) < 0.5 and not force_pallas:
        return _xla()

    x2 = x.reshape(M, L)
    row_align = _sublane_multiple(x2.dtype, s2.dtype, out_dtype)
    blk_isz = max(x2.dtype.itemsize, out_isz)
    rb, cw = _choose_tiles(M, L, row_align, blk_isz, target_block_bytes)
    grid = (pl.cdiv(M, rb), pl.cdiv(L, cw))

    channel_path = (s2.shape[1] == 1)
    if channel_path:
        s_spec = pl.BlockSpec((rb, 1), lambda i, j: (i, 0))
        s_blk_bytes = rb * 128 * s2.dtype.itemsize  # (rb,1) pads to 128 lanes
    else:
        s_spec = pl.BlockSpec((rb, cw), lambda i, j: (i, j))
        s_blk_bytes = rb * cw * s2.dtype.itemsize

    # Explicit scoped-VMEM budget: double-buffered x + out + scale blocks plus
    # headroom.  (Default scoped VMEM is 16 MiB on v5e, 32 MiB on v6e/v7x;
    # v7x physical VMEM is 64 MiB, so cap well below that.)
    per_step = rb * cw * (x2.dtype.itemsize + out_isz) + s_blk_bytes
    vmem_limit = int(min(max(2 * per_step + (4 << 20), 24 << 20), 56 << 20))

    bytes_accessed = int(x2.size * x2.dtype.itemsize
                         + s2.size * s2.dtype.itemsize
                         + M * L * out_isz)

    out2 = pl.pallas_call(
        _mul_kernel,
        out_shape=jax.ShapeDtypeStruct((M, L), out_dtype),
        grid_spec=pl.GridSpec(
            grid=grid,
            in_specs=[
                pl.BlockSpec((rb, cw), lambda i, j: (i, j)),
                s_spec,
            ],
            out_specs=pl.BlockSpec((rb, cw), lambda i, j: (i, j)),
        ),
        compiler_params=pltpu.CompilerParams(
            dimension_semantics=("parallel", "parallel"),
            vmem_limit_bytes=vmem_limit),
        cost_estimate=pl.CostEstimate(
            flops=M * L, transcendentals=0, bytes_accessed=bytes_accessed),
    )(x2, s2)
    return out2.reshape(N, C, H, W)


if __name__ == "__main__":
    key = jax.random.PRNGKey(0)
    kx, ks, kf, kr, kb = jax.random.split(key, 5)

    # 1) Canonical ScaleChannels usage: x (N,C,H,W) scaled by other (N,C,1,1).
    x = jax.random.normal(kx, (2, 4, 16, 16), dtype=jnp.float32)
    scale = jax.random.normal(ks, (2, 4, 1, 1), dtype=jnp.float32)
    out = jax.block_until_ready(scale_channels(x, scale, force_pallas=True))
    ref = np.asarray(scale) * np.asarray(x)
    assert out.shape == x.shape, out.shape
    np.testing.assert_allclose(np.asarray(out), ref, rtol=1e-6, atol=1e-6)

    # 2) Full-shape `other` (plain elementwise multiply) through the kernel.
    other = jax.random.normal(kf, (2, 4, 16, 16), dtype=jnp.float32)
    out2 = jax.block_until_ready(scale_channels(x, other, force_pallas=True))
    np.testing.assert_allclose(
        np.asarray(out2), np.asarray(other) * np.asarray(x),
        rtol=1e-6, atol=1e-6)

    # 3) Ragged row count (M = 3*5 = 15, not a multiple of 8): cdiv grid +
    #    edge-block handling.
    xr = jax.random.normal(kr, (3, 5, 16, 16), dtype=jnp.float32)
    sr = jax.random.normal(ks, (3, 5, 1, 1), dtype=jnp.float32)
    out3 = jax.block_until_ready(scale_channels(xr, sr, force_pallas=True))
    np.testing.assert_allclose(
        np.asarray(out3), np.asarray(sr) * np.asarray(xr),
        rtol=1e-6, atol=1e-6)

    # 4) bf16 path (16-row sublane alignment) + lane tiling for >=2 grid steps.
    xb = jax.random.normal(kb, (2, 8, 16, 16), dtype=jnp.bfloat16)
    sb = (jnp.arange(16, dtype=jnp.bfloat16).reshape(2, 8, 1, 1) * 0.25 + 0.5)
    out4 = jax.block_until_ready(scale_channels(xb, sb, force_pallas=True))
    ref4 = np.asarray(sb.astype(jnp.float32)) * np.asarray(xb.astype(jnp.float32))
    np.testing.assert_allclose(
        np.asarray(out4.astype(jnp.float32)), ref4, rtol=2e-2, atol=2e-2)

    # 5) Small-tensor early-out (default threshold -> fused XLA multiply).
    out5 = jax.block_until_ready(scale_channels(x, scale))
    np.testing.assert_allclose(np.asarray(out5), ref, rtol=1e-6, atol=1e-6)

    print("KERNEL_OK")
</pallas_src>

<mosaic_0001>
module attributes {stable_mosaic.version = 11 : i64} {
  func.func @_mul_kernel(%arg0: i32, %arg1: i32, %arg2: memref<8x128xf32, #tpu.memory_space<vmem>>, %arg3: memref<8x1xf32, #tpu.memory_space<vmem>>, %arg4: memref<8x128xf32, #tpu.memory_space<vmem>>) attributes {dimension_semantics = [#tpu.dimension_semantics<parallel>, #tpu.dimension_semantics<parallel>], iteration_bounds = array<i64: 1, 2>, scalar_prefetch = 0 : i64, scratch_operands = 0 : i64, tpu.core_type = #tpu.core_type<tc>, window_params = [{transform_indices = @transform_0, window_bounds = array<i64: 8, 128>}, {transform_indices = @transform_1, window_bounds = array<i64: 8, 1>}, {transform_indices = @transform_2, window_bounds = array<i64: 8, 128>}]} {
    %c0 = arith.constant 0 : index
    %c0_0 = arith.constant 0 : index
    %0 = vector.load %arg2[%c0, %c0_0] : memref<8x128xf32, #tpu.memory_space<vmem>>, vector<8x128xf32>
    %c0_1 = arith.constant 0 : index
    %c0_2 = arith.constant 0 : index
    %1 = vector.load %arg3[%c0_1, %c0_2] : memref<8x1xf32, #tpu.memory_space<vmem>>, vector<8x1xf32>
    %2 = vector.broadcast %1 : vector<8x1xf32> to vector<8x128xf32>
    %3 = arith.mulf %0, %2 : vector<8x128xf32>
    %c0_3 = arith.constant 0 : index
    %c0_4 = arith.constant 0 : index
    %4 = vector.load %arg4[%c0_3, %c0_4] : memref<8x128xf32, #tpu.memory_space<vmem>>, vector<8x128xf32>
    tpu.vector_store %arg4[%c0_3, %c0_4], %3 {strides = array<i32>} : memref<8x128xf32, #tpu.memory_space<vmem>>, vector<8x128xf32>,
    return
  }
  func.func @transform_0(%arg0: i32, %arg1: i32) -> (i32, i32) {
    %c0_i32 = arith.constant 0 : i32
    return %arg0, %arg1 : i32, i32
  }
  func.func @transform_1(%arg0: i32, %arg1: i32) -> (i32, i32) {
    %c0_i32 = arith.constant 0 : i32
    %c0_i32_0 = arith.constant 0 : i32
    return %arg0, %c0_i32 : i32, i32
  }
  func.func @transform_2(%arg0: i32, %arg1: i32) -> (i32, i32) {
    %c0_i32 = arith.constant 0 : i32
    return %arg0, %arg1 : i32, i32
  }
}

</mosaic_0001>

<bundles_post_ra>
// kernel: tpu_custom_call.1
= control target key start
LH: loop header
LB: loop body
LE: loop exit
PB: predicated region body
PF: predicated region fallthrough
CT: control target
= control target key end

     0   :  { %7 = vsyncpa [#allocation3], 0  ;;  %s659_s0 = inlined_call_operand.hbm [shape: f32[8,256], index: 0, kind: input, shape index: {}]   ;;  %s660_s1 = inlined_call_operand.vmem [shape: f32[8,1], index: 1, kind: input, shape index: {}]   ;;  %s661_s2 = inlined_call_operand.hbm [shape: f32[8,256], index: 2, kind: output, shape index: {}]  }
   0x1   :  { %9 = vsyncpa [#allocation3 + $0x1], 0 }
   0x2   :  { %10 = vsyncpa [#allocation4], 0 }
   0x3   :  { %12 = vsyncpa [#allocation4 + $0x1], 0  ;;  %s522_s9 = smov 0   ;;  %s524_s10 = smov 0  }
   0x4   :  { %s526_s11 = smov 0   ;;  %s528_s12 = smov 0  }
   0x5   :  { %s530_s13 = smov 0   ;;  %s532_s14 = smov 0  }
   0x6 LB: > { %s316_s15 = sadd.s32 4294967295, %s502_s14   ;;  %s317_s16 = sadd.s32 4294967294, %s502_s14   ;;  %s502_s14 = sphi %s532_s14, %s18_s14   ;;  %s498_s13 = sphi %s530_s13, %s673_s13   ;;  %s494_s12 = sphi %s528_s12, %s672_s12   ;;  %s490_s11 = sphi %s526_s11, %s671_s11   ;;  %s486_s10 = sphi %s524_s10, %s670_s10   ;;  %s482_s9 = sphi %s522_s9, %s669_s9  }
   0x7   : > { %s27_s17 = sadd.s32 1, %s498_s13  ;;  %s39_s18 = sadd.s32 1, %s490_s11 }
   0x8   : > { %p28_p0 = scmp.ge.s32.totalorder %s27_s17, 2  ;;  %p46_p1 = scmp.ne.s32.totalorder %s490_s11, %s486_s10 }
   0x9   : > { %p47_p2 = scmp.eq.s32.totalorder %s502_s14, 0  ;;  %p52_p3 = scmp.ne.s32.totalorder %s486_s10, %s482_s9 }
   0xa   : > { %s675_s17 = smov (%p28_p0, %s27_s17), 0  ;;  %p53_p5 = scmp.eq.s32.totalorder %s316_s15, 0 }
   0xb   : > { %p563_p4 = por %p47_p2, %p46_p1  ;;  %s35_s20 = ssub.s32 %s498_s13, %s675_s17 }
   0xc   : > { %p104_p6 = scmp.eq.s32.totalorder %s316_s15, 1  ;;  %p37_p7 = scmp.eq.s32.totalorder %s35_s20, 0 }
   0xd   : > { %p569_p8 = por %p53_p5, %p52_p3  ;;  %p110_p10 = scmp.eq.s32.totalorder %s317_s16, 1 }
   0xe   : > { %p573_p9 = por %p104_p6, %p46_p1  ;;  %p342_p13 = scmp.lt.s32.totalorder %s502_s14, 2 }
   0xf   : > { %s578_s23 = scalar_select %p37_p7, %s490_s11, %s39_s18  }
  0x10   : > { %p580_p11 = por %p110_p10, %p52_p3  ;;  %s137_s25 = sand.u32 1, %s490_s11  }
  0x11   : > { %s321_s26 = sshll.u32 %s137_s25, 3  ;;  %s322_s27 = sshll.u32 %s498_s13, 7 }
  0x12   : > { %s665_s24 = scalar_select %p580_p11, 1, 0 }
  0x13   : > { %s148_s30 = scalar_lea.hbm %s659_s0, %s322_s27  ;;  %s141_s3 = scalar_lea.vmem [#allocation2], %s321_s26 }
  0x14   : > { %s150_s4 = sshll.u32 %s141_s3, 4  ;;  %p593_p0 = pnand %p342_p13, %p563_p4  ;;  %s151_s4 = int_to_ptr.vmem [resolvable:$true] %s150_s4 }
  0x15   : > { %p323_p1 = scmp.ge.s32.totalorder %s502_s14, 1  ;;  %p155_p2 = scmp.lt.s32.totalorder %s502_s14, 3 }
  0x16   : > { %s138_s6 = scalar_lea.sflag [#allocation3], %s137_s25  ;;  %p396_p3 = pneg %p593_p0 }
  0x17   : > { %s407_s7 = scalar_lea.vmem %s151_s4, 128  ;;  %s504_s8 = smov [#allocation2]  }
  0x18   : > { %p408_p5 = scmp.ne.s32.totalorder %s151_s4, %s407_s7  ;;  %s412_s15 = sshll.u32 %s504_s8, 4  ;;  %s413_s15 = int_to_ptr.vmem [resolvable:$false] %s412_s15 }
  0x19   : > { %s414_s16 = scalar_lea.vmem %s413_s15, 256  ;;  %p415_p10 = scmp.lt.s32.totalorder %s151_s4, %s413_s15 }
  0x1a   : > { %p410_p6 = pnand %p408_p5, %p396_p3  ;;  %p416_p12 = scmp.lt.s32.totalorder %s414_s16, %s407_s7 }
  0x1c   : > { %p411_p7 = pneg %p410_p6  ;;  %p417_p4 = por %p416_p12, %p415_p10 }
  0x1e   : > { %p418_p13 = pnand %p417_p4, %p411_p7 }
  0x20   : > { %421 = shalt.err (!%p418_p13)
}
  0x21   : > { %337 = dma.hbm_to_vmem [thread:$0]  (!%p593_p0), %s148_s30, 128, %s151_s4, %s138_s6  }
  0x22   : > { %p156_p11 = pnand %p323_p1, %p155_p2 }
  0x23   : > { %s608_s18 = sand.u32 (!%p156_p11), 1, %s486_s10  }
  0x24   : > { %159 = sbr.rel (%p156_p11) target bundleno = 183 (0xb7), region = 28  ;;  %s324_s19 = sshll.u32 (!%p156_p11), %s608_s18, 3 }
  0x25   : > { %s162_s20 = scalar_lea.sflag (!%p156_p11), [#allocation3], %s608_s18  ;;  %s165_s25 = scalar_lea.vmem (!%p156_p11), [#allocation2], %s324_s19 }
  0x29   : > { %473 = dma.done.wait (%p569_p8), %s162_s20, 128  }
  0x2a   : > { %475 = vsyncadd (%p569_p8), %s162_s20, 4294967168  ;;  %v505_v0 = vmov 0   ;;  %v195_v1 = vld [vmem:[%s660_s1] sm:$0xff]  ;;  %s327_s28 = sshll.u32 %s494_s12, 7  ;;  %s189_s29 = scalar_lea.vmem [#allocation5], %s324_s19 }
  0x2b   : > { %393 = vset.pattern.permute.xlu0 %v505_v0  ;;  %v194_v2 = vld [vmem:[%s165_s25] sm:$0xff]  ;;  %s219_s30 = sshll.u32 %s189_s29, 4  ;;  %s217_s21 = scalar_lea.hbm %s661_s2, %s327_s28  ;;  %s220_s30 = int_to_ptr.vmem [resolvable:$true] %s219_s30 }
  0x2c   : > { %198 = vperm.xlu0 %393, %v195_v1   ;;  %s204_s5 = scalar_lea.sflag [#allocation4], %s608_s18  ;;  %s422_s6 = scalar_lea.vmem %s220_s30, 128 }
  0x2d   : > { %p423_p8 = scmp.ne.s32.totalorder %s220_s30, %s422_s6  ;;  %s506_s7 = smov [#allocation5]  }
  0x2e   : > { %s426_s8 = sshll.u32 %s506_s7, 4  ;;  %s427_s8 = int_to_ptr.vmem [resolvable:$false] %s426_s8 }
  0x2f   : > { %p424_p11 = pnand %p423_p8, %p573_p9  ;;  %s428_s12 = scalar_lea.vmem %s427_s8, 256 }
  0x30   : > { %p429_p0 = scmp.lt.s32.totalorder %s220_s30, %s427_s8  ;;  %p430_p1 = scmp.lt.s32.totalorder %s428_s12, %s422_s6 }
  0x31   : > { %p425_p12 = pneg %p424_p11 }
  0x32   : > { %p431_p2 = por %p430_p1, %p429_p0 }
  0x34   : > { %p432_p3 = pnand %p431_p2, %p425_p12 }
  0xa7   : > { %v199_v3 = vpop.permute.xlu0 %198 }
  0xa8   : > { %v201_v4 = vmul.f32 %v199_v3, %v194_v2 }
  0xaa   : > { %202 = vst [vmem:[%s189_s29] sm:$0xff] %v201_v4 }
  0xab   : > { %435 = shalt.err (!%p432_p3)
}
  0xac   : > { %s436_s15 = scalar_lea.hbm %s217_s21, 128  ;;  %s440_s19 = scalar_lea.hbm %s661_s2, 256 }
  0xad   : > { %p437_p5 = scmp.ne.s32.totalorder %s217_s21, %s436_s15  ;;  %p441_p10 = scmp.lt.s32.totalorder %s217_s21, %s661_s2 }
  0xae   : > { %p442_p4 = scmp.lt.s32.totalorder %s440_s19, %s436_s15 }
  0xaf   : > { %p438_p6 = pnand %p437_p5, %p573_p9 }
  0xb0   : > { %p443_p13 = por %p442_p4, %p441_p10 }
  0xb1   : > { %p439_p7 = pneg %p438_p6 }
  0xb3   : > { %p444_p8 = pnand %p443_p13, %p439_p7 }
  0xb5   : > { %447 = shalt.err (!%p444_p8)
}
  0xb6   : > { %332 = dma.vmem_to_hbm [thread:$0]  (%p573_p9), %s220_s30, 128, %s217_s21, %s204_s5  }
  0xb7 PF: > { %s231_s26 = sand.u32 1, %s482_s9   ;;  %p667_p11 = scmp.ne.s32.totalorder %s665_s24, 0 }
  0xb8   : > { %p668_p12 = scmp.ge.s32.totalorder %s502_s14, 2  ;;  %s232_s27 = scalar_lea.sflag [#allocation4], %s231_s26 }
  0xba   : > { %p339_p0 = pnand %p668_p12, %p667_p11 }
  0xbc   : > { %p340_p1 = pneg %p339_p0 }
  0xbe   : > { %477 = dma.done.wait (%p340_p1), %s232_s27, 128  }
  0xbf   : > { %479 = vsyncadd (%p340_p1), %s232_s27, 4294967168  ;;  %s18_s14 = sadd.s32 1, %s502_s14   ;;  %s669_s9 = smov %s486_s10 }
  0xc0   : > { %p15_p2 = scmp.ge.s32.totalorder %s18_s14, 4   ;;  %s670_s10 = smov %s490_s11 }
  0xc1   : > { %s671_s11 = smov %s578_s23  ;;  %s672_s12 = smov %s498_s13 }
  0xc2   : > { %s673_s13 = smov %s675_s17  ;;  %17 = sbr.rel (!%p15_p2) target bundleno = 6 (0x6), region = 76 }
  0xc7   :  { %237 = vsyncpa [#allocation3], 1 }
  0xc8   :  { %239 = vsyncpa [#allocation3 + $0x1], 1 }
  0xc9   :  { %240 = vsyncpa [#allocation4], 1 }
  0xca   :  { %242 = vsyncpa [#allocation4 + $0x1], 1 }

</bundles_post_ra>
